<compile_context>
chip_gen: v7x
topology: tpu7x:2x2x1
jax: 0.10.0
libtpu: 0.0.40
codegen_flags: <defaults>
</compile_context>

<pallas_src>
import jax
import jax.numpy as jnp
from jax.experimental import pallas as pl
from jax.experimental.pallas import tpu as pltpu

_LANE = 128


def _round_up(x, m):
    return ((x + m - 1) // m) * m


def _vmem_limit_bytes(n_nodes, n_edges, d):
    """Resident-footprint-derived scoped-VMEM request (with headroom)."""
    resident = (
        2 * n_nodes * n_edges * 2          # B + B^T bf16 scratch (single-buffered)
        + n_nodes * d * 4                  # x0 carry output block
        + n_edges * d * 4                  # x1 output block
        + 2 * (d * d * 2 + d * 4)          # per-layer W/b (double-buffered)
        + 2 * n_nodes * 4                  # 1/deg_v (double-buffered)
        + (2 * n_nodes * d + 2 * n_edges * d) * 4   # h / agg / x1 temporaries
    )
    budget = int(resident * 1.5) + (2 << 20)
    # Never below the old default; cap at 64 MiB so the request is also valid
    # on v7x (64 MiB physical VMEM).  On v5e/v6e (128 MiB) this cap could be
    # raised toward ~100 MiB for much larger graphs.
    return min(max(budget, 32 << 20), 64 << 20)


def unisage_fused_kernel(x0_hbm, inc_hbm, incT_hbm, invdeg_ref, w_ref, b_ref,
                         x0_out_ref, x1_out_ref, inc_vmem, incT_vmem):
    """One grid step == one UniSAGELayer; x0 carried in the resident x0 block."""
    layer = pl.program_id(0)
    last = pl.num_programs(0) - 1

    @pl.when(layer == 0)
    def _():
        # One-time DMAs: seed the carried node features and make B / B^T
        # resident in single-buffered VMEM scratch for the whole layer stack.
        pltpu.sync_copy(x0_hbm, x0_out_ref)
        pltpu.sync_copy(inc_hbm, inc_vmem)
        pltpu.sync_copy(incT_hbm, incT_vmem)

    x = x0_out_ref[...]                       # (N, D)  f32 carry
    inc = inc_vmem[...]                       # (N, E)  bf16, resident all layers
    incT = incT_vmem[...]                     # (E, N)  bf16, resident all layers
    w = w_ref[0]                              # (D, D)  bf16 (this layer)
    b = b_ref[0]                              # (1, D)  f32  (this layer)

    # Linear: bf16 MXU operands, f32 accumulation; bias folded on the f32 result.
    h = jnp.dot(x.astype(jnp.bfloat16), w,
                preferred_element_type=jnp.float32) + b              # (N, D)

    # vertex -> edge (sum aggregation): x_1 = B^T @ h.  B^T was transposed once
    # in the wrapper, so this is a natural MXU matmul (no per-layer XLU work).
    x1 = jnp.dot(incT, h.astype(jnp.bfloat16),
                 preferred_element_type=jnp.float32)                 # (E, D)

    # edge -> vertex (mean aggregation): (B @ x_1) * (1/deg_v).
    agg = jnp.dot(inc, x1.astype(jnp.bfloat16),
                  preferred_element_type=jnp.float32) * invdeg_ref[...]  # (N, D)

    # Residual + ReLU (layer_drop is identity in eval mode); f32 VPU path.
    x0_out_ref[...] = jnp.maximum(h + agg, 0.0)

    # Only the final layer's x1 is observable; skip the E*D store otherwise.
    @pl.when(layer == last)
    def _():
        x1_out_ref[...] = x1


def unisage_forward(x0, incidence, params):
    """UniSAGE forward: all layers fused into a single pallas_call."""
    n_nodes, in_channels = x0.shape
    n_edges = incidence.shape[1]
    n_layers = len(params)
    hidden = params[-1][0].shape[1]

    # Common lane-dense feature width for the whole layer stack, derived from
    # the max width over ALL layers (avoids silent truncation of wide layers).
    widths = [in_channels] + [w.shape[1] for (w, _) in params]
    d = _round_up(max(widths), _LANE)

    # Zero-pad node features / weights / bias to width D (exact: padded W cols
    # and b entries are zero, so padding stays zero through the pipeline).
    x0_p = jnp.zeros((n_nodes, d), jnp.float32).at[:, :in_channels].set(x0)

    w_stack = jnp.zeros((n_layers, d, d), jnp.float32)
    b_stack = jnp.zeros((n_layers, 1, d), jnp.float32)
    for i, (w, bvec) in enumerate(params):
        ci, co = w.shape
        w_stack = w_stack.at[i, :ci, :co].set(w)
        b_stack = b_stack.at[i, :, :co].set(bvec)
    w_stack = w_stack.astype(jnp.bfloat16)     # MXU operands in bf16

    inc_bf16 = incidence.astype(jnp.bfloat16)  # 0/1 exact in bf16, halves bytes
    incT_bf16 = inc_bf16.T                     # transposed ONCE in the wrapper

    # Layer-invariant degree normalization (guard isolated nodes).
    deg_v = jnp.sum(incidence, axis=1, keepdims=True)
    inv_deg = 1.0 / jnp.maximum(deg_v, 1.0)    # (N, 1) f32

    x0_out_p, x1_out_p = pl.pallas_call(
        unisage_fused_kernel,
        grid=(n_layers,),
        in_specs=[
            pl.BlockSpec(memory_space=pl.ANY),                     # x0 (seed via DMA)
            pl.BlockSpec(memory_space=pl.ANY),                     # B   (DMA'd once)
            pl.BlockSpec(memory_space=pl.ANY),                     # B^T (DMA'd once)
            pl.BlockSpec((n_nodes, 1), lambda l: (0, 0)),          # 1/deg_v
            pl.BlockSpec((1, d, d), lambda l: (l, 0, 0)),          # per-layer W
            pl.BlockSpec((1, 1, d), lambda l: (l, 0, 0)),          # per-layer b
        ],
        out_specs=(
            pl.BlockSpec((n_nodes, d), lambda l: (0, 0)),          # x0 carry / result
            pl.BlockSpec((n_edges, d), lambda l: (0, 0)),          # x1 (last layer)
        ),
        out_shape=(
            jax.ShapeDtypeStruct((n_nodes, d), jnp.float32),
            jax.ShapeDtypeStruct((n_edges, d), jnp.float32),
        ),
        scratch_shapes=[
            pltpu.VMEM((n_nodes, n_edges), jnp.bfloat16),          # resident B
            pltpu.VMEM((n_edges, n_nodes), jnp.bfloat16),          # resident B^T
        ],
        compiler_params=pltpu.CompilerParams(
            dimension_semantics=("arbitrary",),                    # layers sequential
            vmem_limit_bytes=_vmem_limit_bytes(n_nodes, n_edges, d)),
    )(x0_p, inc_bf16, incT_bf16, inv_deg, w_stack, b_stack)

    # Slice the lane padding back off.
    return x0_out_p[:, :hidden], x1_out_p[:, :hidden]


def init_unisage_params(key, in_channels, hidden_channels, n_layers):
    """Deterministic PyTorch-Linear-style init (uniform +/- 1/sqrt(fan_in))."""
    params = []
    c_in = in_channels
    for _ in range(n_layers):
        key, kw, kb = jax.random.split(key, 3)
        bound = 1.0 / jnp.sqrt(jnp.float32(c_in))
        w = jax.random.uniform(kw, (c_in, hidden_channels), jnp.float32,
                               -bound, bound)
        b = jax.random.uniform(kb, (1, hidden_channels), jnp.float32,
                               -bound, bound)
        params.append((w, b))
        c_in = hidden_channels
    return params


def unisage_reference(x0, incidence, params):
    """Pure-JAX f32 reference (same semantics) for a tolerance check."""
    inv_deg = 1.0 / jnp.maximum(jnp.sum(incidence, axis=1, keepdims=True), 1.0)
    x1 = None
    for (w, b) in params:
        h = x0 @ w + b
        x1 = incidence.T @ h
        agg = (incidence @ x1) * inv_deg
        x0 = jax.nn.relu(h + agg)
    return x0, x1


if __name__ == "__main__":
    key = jax.random.PRNGKey(0)
    n_nodes, n_edges = 16, 8
    in_channels, hidden_channels, n_layers = 4, 32, 2

    k_x, k_inc, k_par = jax.random.split(key, 3)

    # Node features.
    x0 = jax.random.normal(k_x, (n_nodes, in_channels), jnp.float32)

    # Dense 0/1 incidence matrix; guarantee every node belongs to >= 1 edge.
    inc = (jax.random.uniform(k_inc, (n_nodes, n_edges)) < 0.3).astype(jnp.float32)
    rows = jnp.arange(n_nodes)
    inc = inc.at[rows, rows % n_edges].set(1.0)

    params = init_unisage_params(k_par, in_channels, hidden_channels, n_layers)

    x0_out, x1_out = unisage_forward(x0, inc, params)
    jax.block_until_ready((x0_out, x1_out))

    assert x0_out.shape == (n_nodes, hidden_channels)
    assert x1_out.shape == (n_edges, hidden_channels)
    assert bool(jnp.all(jnp.isfinite(x0_out))) and bool(jnp.all(jnp.isfinite(x1_out)))

    # Tolerance check vs f32 reference (bf16 MXU operands => small drift).
    x0_ref, x1_ref = unisage_reference(x0, inc, params)

    def rel_err(a, b):
        return float(jnp.max(jnp.abs(a - b)) / (jnp.max(jnp.abs(b)) + 1e-6))

    assert rel_err(x0_out, x0_ref) < 0.1, rel_err(x0_out, x0_ref)
    assert rel_err(x1_out, x1_ref) < 0.1, rel_err(x1_out, x1_ref)

    print("KERNEL_OK")
</pallas_src>

<mosaic_0001>
module attributes {stable_mosaic.version = 11 : i64} {
  func.func @unisage_fused_kernel(%arg0: i32, %arg1: memref<16x128xf32, #tpu.memory_space<any>>, %arg2: memref<16x8xbf16, #tpu.memory_space<any>>, %arg3: memref<8x16xbf16, #tpu.memory_space<any>>, %arg4: memref<16x1xf32, #tpu.memory_space<vmem>>, %arg5: memref<1x128x128xbf16, #tpu.memory_space<vmem>>, %arg6: memref<1x1x128xf32, #tpu.memory_space<vmem>>, %arg7: memref<16x128xf32, #tpu.memory_space<vmem>>, %arg8: memref<8x128xf32, #tpu.memory_space<vmem>>, %arg9: memref<16x8xbf16, #tpu.memory_space<vmem>>, %arg10: memref<8x16xbf16, #tpu.memory_space<vmem>>) attributes {dimension_semantics = [#tpu.dimension_semantics<arbitrary>], iteration_bounds = array<i64: 2>, scalar_prefetch = 0 : i64, scratch_operands = 2 : i64, tpu.core_type = #tpu.core_type<tc>, window_params = [{}, {}, {}, {pipeline_mode = #tpu.pipeline_mode<synchronous>, transform_indices = @transform_3, window_bounds = array<i64: 16, 1>}, {transform_indices = @transform_4, window_bounds = array<i64: 1, 128, 128>}, {transform_indices = @transform_5, window_bounds = array<i64: 1, 1, 128>}, {pipeline_mode = #tpu.pipeline_mode<synchronous>, transform_indices = @transform_6, window_bounds = array<i64: 16, 128>}, {pipeline_mode = #tpu.pipeline_mode<synchronous>, transform_indices = @transform_7, window_bounds = array<i64: 8, 128>}]} {
    %c0_i32 = arith.constant 0 : i32
    %0 = arith.cmpi eq, %arg0, %c0_i32 : i32
    %1 = arith.extui %0 : i1 to i32
    %c0_i32_0 = arith.constant 0 : i32
    %2 = arith.cmpi ne, %1, %c0_i32_0 : i32
    scf.if %2 {
      "tpu.region"() ({
        %28 = tpu.sem_alloc : memref<!tpu.dma_semaphore, #tpu.memory_space<semaphore_mem>>
        tpu.enqueue_dma source(%arg1 : memref<16x128xf32, #tpu.memory_space<any>>) target(%arg7 : memref<16x128xf32, #tpu.memory_space<vmem>>) target_semaphore(%28 : memref<!tpu.dma_semaphore, #tpu.memory_space<semaphore_mem>>)
        tpu.wait_dma2 semaphore(%28 : memref<!tpu.dma_semaphore, #tpu.memory_space<semaphore_mem>>) src(%arg1 : memref<16x128xf32, #tpu.memory_space<any>>) dst(%arg7 : memref<16x128xf32, #tpu.memory_space<vmem>>)
        tpu.yield
      }) : () -> ()
      "tpu.region"() ({
        %28 = tpu.sem_alloc : memref<!tpu.dma_semaphore, #tpu.memory_space<semaphore_mem>>
        tpu.enqueue_dma source(%arg2 : memref<16x8xbf16, #tpu.memory_space<any>>) target(%arg9 : memref<16x8xbf16, #tpu.memory_space<vmem>>) target_semaphore(%28 : memref<!tpu.dma_semaphore, #tpu.memory_space<semaphore_mem>>)
        tpu.wait_dma2 semaphore(%28 : memref<!tpu.dma_semaphore, #tpu.memory_space<semaphore_mem>>) src(%arg2 : memref<16x8xbf16, #tpu.memory_space<any>>) dst(%arg9 : memref<16x8xbf16, #tpu.memory_space<vmem>>)
        tpu.yield
      }) : () -> ()
      "tpu.region"() ({
        %28 = tpu.sem_alloc : memref<!tpu.dma_semaphore, #tpu.memory_space<semaphore_mem>>
        tpu.enqueue_dma source(%arg3 : memref<8x16xbf16, #tpu.memory_space<any>>) target(%arg10 : memref<8x16xbf16, #tpu.memory_space<vmem>>) target_semaphore(%28 : memref<!tpu.dma_semaphore, #tpu.memory_space<semaphore_mem>>)
        tpu.wait_dma2 semaphore(%28 : memref<!tpu.dma_semaphore, #tpu.memory_space<semaphore_mem>>) src(%arg3 : memref<8x16xbf16, #tpu.memory_space<any>>) dst(%arg10 : memref<8x16xbf16, #tpu.memory_space<vmem>>)
        tpu.yield
      }) : () -> ()
    } else {
    }
    %c0 = arith.constant 0 : index
    %c0_1 = arith.constant 0 : index
    %3 = vector.load %arg7[%c0, %c0_1] : memref<16x128xf32, #tpu.memory_space<vmem>>, vector<16x128xf32>
    %c0_2 = arith.constant 0 : index
    %c0_3 = arith.constant 0 : index
    %4 = vector.load %arg9[%c0_2, %c0_3] : memref<16x8xbf16, #tpu.memory_space<vmem>>, vector<16x8xbf16>
    %c0_4 = arith.constant 0 : index
    %c0_5 = arith.constant 0 : index
    %5 = vector.load %arg10[%c0_4, %c0_5] : memref<8x16xbf16, #tpu.memory_space<vmem>>, vector<8x16xbf16>
    %c0_6 = arith.constant 0 : index
    %c0_7 = arith.constant 0 : index
    %c0_8 = arith.constant 0 : index
    %6 = vector.load %arg5[%c0_6, %c0_7, %c0_8] : memref<1x128x128xbf16, #tpu.memory_space<vmem>>, vector<1x128x128xbf16>
    %7 = vector.shape_cast %6 : vector<1x128x128xbf16> to vector<128x128xbf16>
    %c0_9 = arith.constant 0 : index
    %c0_10 = arith.constant 0 : index
    %c0_11 = arith.constant 0 : index
    %8 = vector.load %arg6[%c0_9, %c0_10, %c0_11] : memref<1x1x128xf32, #tpu.memory_space<vmem>>, vector<1x1x128xf32>
    %9 = vector.shape_cast %8 : vector<1x1x128xf32> to vector<1x128xf32>
    %10 = arith.truncf %3 : vector<16x128xf32> to vector<16x128xbf16>
    %cst = arith.constant dense<0.000000e+00> : vector<16x128xf32>
    %11 = tpu.matmul %10, %7, %cst {dimension_numbers = #tpu.dot_dimension_numbers<[1], [0], [0], [1], [0, 0, 1, 1], [], []>} : vector<16x128xbf16>, vector<128x128xbf16>, vector<16x128xf32> -> vector<16x128xf32>
    %12 = vector.broadcast %9 : vector<1x128xf32> to vector<16x128xf32>
    %13 = arith.addf %11, %12 : vector<16x128xf32>
    %14 = arith.truncf %13 : vector<16x128xf32> to vector<16x128xbf16>
    %cst_12 = arith.constant dense<0.000000e+00> : vector<8x128xf32>
    %15 = tpu.matmul %5, %14, %cst_12 {dimension_numbers = #tpu.dot_dimension_numbers<[1], [0], [0], [1], [0, 0, 1, 1], [], []>} : vector<8x16xbf16>, vector<16x128xbf16>, vector<8x128xf32> -> vector<8x128xf32>
    %16 = arith.truncf %15 : vector<8x128xf32> to vector<8x128xbf16>
    %cst_13 = arith.constant dense<0.000000e+00> : vector<16x128xf32>
    %17 = tpu.matmul %4, %16, %cst_13 {dimension_numbers = #tpu.dot_dimension_numbers<[1], [0], [0], [1], [0, 0, 1, 1], [], []>} : vector<16x8xbf16>, vector<8x128xbf16>, vector<16x128xf32> -> vector<16x128xf32>
    %c0_14 = arith.constant 0 : index
    %c0_15 = arith.constant 0 : index
    %18 = vector.load %arg4[%c0_14, %c0_15] : memref<16x1xf32, #tpu.memory_space<vmem>>, vector<16x1xf32>
    %19 = vector.broadcast %18 : vector<16x1xf32> to vector<16x128xf32>
    %20 = arith.mulf %17, %19 : vector<16x128xf32>
    %21 = arith.addf %13, %20 : vector<16x128xf32>
    %cst_16 = arith.constant 0.000000e+00 : f32
    %22 = vector.broadcast %cst_16 : f32 to vector<16x128xf32>
    %23 = arith.maximumf %21, %22 : vector<16x128xf32>
    %c0_17 = arith.constant 0 : index
    %c0_18 = arith.constant 0 : index
    %24 = vector.load %arg7[%c0_17, %c0_18] : memref<16x128xf32, #tpu.memory_space<vmem>>, vector<16x128xf32>
    tpu.vector_store %arg7[%c0_17, %c0_18], %23 {strides = array<i32>} : memref<16x128xf32, #tpu.memory_space<vmem>>, vector<16x128xf32>,
    %c1_i32 = arith.constant 1 : i32
    %25 = arith.cmpi eq, %arg0, %c1_i32 : i32
    %26 = arith.extui %25 : i1 to i32
    %c0_i32_19 = arith.constant 0 : i32
    %27 = arith.cmpi ne, %26, %c0_i32_19 : i32
    scf.if %27 {
      %c0_20 = arith.constant 0 : index
      %c0_21 = arith.constant 0 : index
      %28 = vector.load %arg8[%c0_20, %c0_21] : memref<8x128xf32, #tpu.memory_space<vmem>>, vector<8x128xf32>
      tpu.vector_store %arg8[%c0_20, %c0_21], %15 {strides = array<i32>} : memref<8x128xf32, #tpu.memory_space<vmem>>, vector<8x128xf32>,
    } else {
    }
    return
  }
  func.func @transform_3(%arg0: i32) -> (i32, i32) {
    %c0_i32 = arith.constant 0 : i32
    %c0_i32_0 = arith.constant 0 : i32
    %c0_i32_1 = arith.constant 0 : i32
    return %c0_i32, %c0_i32_0 : i32, i32
  }
  func.func @transform_4(%arg0: i32) -> (i32, i32, i32) {
    %c0_i32 = arith.constant 0 : i32
    %c0_i32_0 = arith.constant 0 : i32
    %c0_i32_1 = arith.constant 0 : i32
    return %arg0, %c0_i32, %c0_i32_0 : i32, i32, i32
  }
  func.func @transform_5(%arg0: i32) -> (i32, i32, i32) {
    %c0_i32 = arith.constant 0 : i32
    %c0_i32_0 = arith.constant 0 : i32
    %c0_i32_1 = arith.constant 0 : i32
    return %arg0, %c0_i32, %c0_i32_0 : i32, i32, i32
  }
  func.func @transform_6(%arg0: i32) -> (i32, i32) {
    %c0_i32 = arith.constant 0 : i32
    %c0_i32_0 = arith.constant 0 : i32
    %c0_i32_1 = arith.constant 0 : i32
    return %c0_i32, %c0_i32_0 : i32, i32
  }
  func.func @transform_7(%arg0: i32) -> (i32, i32) {
    %c0_i32 = arith.constant 0 : i32
    %c0_i32_0 = arith.constant 0 : i32
    %c0_i32_1 = arith.constant 0 : i32
    return %c0_i32, %c0_i32_0 : i32, i32
  }
}

</mosaic_0001>

<bundles_post_ra>
// kernel: tpu_custom_call.1
= control target key start
LH: loop header
LB: loop body
LE: loop exit
PB: predicated region body
PF: predicated region fallthrough
CT: control target
= control target key end

     0   :  { %13 = vsyncpa [#allocation5], 0  ;;  %s1237_s0 = inlined_call_operand.vmem [shape: f32[16,128], index: 0, kind: input, shape index: {}]   ;;  %s1238_s1 = inlined_call_operand.vmem [shape: bf16[16,8], index: 1, kind: input, shape index: {}]   ;;  %s1239_s2 = inlined_call_operand.vmem [shape: bf16[8,16], index: 2, kind: input, shape index: {}]   ;;  %s1240_s3 = inlined_call_operand.vmem [shape: f32[16,1], index: 3, kind: input, shape index: {}]   ;;  %s1241_s4 = inlined_call_operand.hbm [shape: bf16[2,128,128], index: 4, kind: input, shape index: {}]   ;;  %s1242_s5 = inlined_call_operand.vmem [shape: f32[2,1,128], index: 5, kind: input, shape index: {}]   ;;  %s1243_s6 = inlined_call_operand.hbm [shape: f32[16,128], index: 6, kind: output, shape index: {0}]   ;;  %s1244_s7 = inlined_call_operand.hbm [shape: f32[8,128], index: 7, kind: output, shape index: {1}]  }
   0x1   :  { %15 = vsyncpa [#allocation5 + $0x1], 0 }
   0x2   :  { %16 = vsyncpa [#allocation6], 0 }
   0x3   :  { %17 = vsyncpa [#allocation9], 0  ;;  %s1043_s24 = smov 0   ;;  %s1045_s25 = smov 0  }
   0x4   :  { %s1047_s26 = smov 0   ;;  %s1049_s27 = smov 0  }
   0x5 LB: > { %s1062_s28 = sadd.s32 4294967295, %s991_s27   ;;  %s1065_s29 = sadd.s32 1, %s991_s27   ;;  %s991_s27 = sphi %s1049_s27, %s1251_s27   ;;  %s987_s26 = sphi %s1047_s26, %s1250_s26   ;;  %s983_s25 = sphi %s1045_s25, %s1249_s25   ;;  %s979_s24 = sphi %s1043_s24, %s1248_s24  }
   0x6   : > { %s48_s30 = ssub.s32 %s991_s27, %s1065_s29  ;;  %s51_s8 = sadd.s32 1, %s987_s26 }
   0x7   : > { %p49_p0 = scmp.eq.s32.totalorder %s48_s30, 0  ;;  %p58_p1 = scmp.ne.s32.totalorder %s987_s26, %s983_s25 }
   0x8   : > { %p59_p2 = scmp.eq.s32.totalorder %s991_s27, 0  ;;  %p64_p3 = scmp.ne.s32.totalorder %s983_s25, %s979_s24 }
   0x9   : > { %s1075_s9 = scalar_select %p49_p0, %s987_s26, %s51_s8  }
   0xa   : > { %p60_p4 = por %p59_p2, %p58_p1  ;;  %p65_p5 = scmp.eq.s32.totalorder %s1062_s28, 0 }
   0xb   : > { %p806_p6 = scmp.lt.s32.totalorder %s991_s27, 2  ;;  %s159_s11 = sand.u32 1, %s987_s26  }
   0xc   : > { %p1079_p7 = por %p65_p5, %p64_p3  ;;  %s722_s12 = sshll.u32 %s159_s11, 6 }
   0xd   : > { %s746_s13 = sshll.u32 %s991_s27, 10  ;;  %s163_s17 = scalar_lea.vmem [#allocation4], %s722_s12 }
   0xe   : > { %s1088_s16 = scalar_lea.hbm %s1241_s4, %s746_s13  ;;  %s170_s18 = sshll.u32 %s163_s17, 4  ;;  %s1090_s18 = int_to_ptr.vmem [resolvable:$true] %s170_s18 }
   0xf   : > { %p1092_p8 = pnand %p806_p6, %p60_p4  ;;  %s1097_s20 = scalar_lea.sflag [#allocation5], %s159_s11 }
  0x10   : > { %s861_s21 = scalar_lea.hbm %s1088_s16, 1024  ;;  %s866_s24 = scalar_lea.hbm %s1241_s4, 2048 }
  0x11   : > { %p862_p10 = scmp.ne.s32.totalorder %s1088_s16, %s861_s21  ;;  %p863_p11 = pneg %p1092_p8 }
  0x12   : > { %p867_p0 = scmp.lt.u32.totalorder %s1088_s16, %s1241_s4  ;;  %p868_p1 = scmp.lt.u32.totalorder %s866_s24, %s861_s21 }
  0x13   : > { %p864_p12 = pnand %p863_p11, %p862_p10  ;;  %p870_p3 = scmp.lt.u32.totalorder %s861_s21, %s1088_s16 }
  0x14   : > { %p869_p2 = por %p868_p1, %p867_p0 }
  0x15   : > { %p865_p13 = pneg %p864_p12 }
  0x16   : > { %p871_p4 = por %p870_p3, %p869_p2 }
  0x18   : > { %p872_p5 = pnand %p871_p4, %p865_p13 }
  0x1a   : > { %875 = shalt.err (!%p872_p5)
}
  0x1b   : > { %s876_s11 = scalar_lea.vmem %s1090_s18, 1024  ;;  %s993_s12 = smov [#allocation4]  }
  0x1c   : > { %p877_p6 = scmp.ne.s32.totalorder %s1090_s18, %s876_s11  ;;  %s881_s13 = sshll.u32 %s993_s12, 4  ;;  %s882_s13 = int_to_ptr.vmem [resolvable:$false] %s881_s13 }
  0x1d   : > { %s883_s14 = scalar_lea.vmem %s882_s13, 2048  ;;  %p884_p9 = scmp.lt.s32.totalorder %s1090_s18, %s882_s13 }
  0x1e   : > { %p879_p10 = pnand %p877_p6, %p863_p11  ;;  %p885_p0 = scmp.lt.s32.totalorder %s883_s14, %s876_s11 }
  0x20   : > { %p880_p12 = pneg %p879_p10  ;;  %p886_p1 = por %p885_p0, %p884_p9 }
  0x22   : > { %p887_p2 = pnand %p886_p1, %p880_p12 }
  0x24   : > { %890 = shalt.err (!%p887_p2)
}
  0x25   : > { %s994_s15 = smov 64   ;;  %s995_s17 = smov 4  }
  0x26   : > { %805 = dma.hbm_to_vmem [thread:$0]  (!%p1092_p8), %s1088_s16, 1024, %s1090_s18, %s1097_s20, %s994_s15, %s994_s15, %s995_s17  }
  0x27   : > { %p184_p11 = scmp.lt.s32.totalorder %s991_s27, 3  ;;  %p1247_p13 = scmp.ge.s32.totalorder %s991_s27, 1 }
  0x29   : > { %p185_p3 = pnand %p1247_p13, %p184_p11 }
  0x2a   : > { %s190_s21 = sand.u32 (!%p185_p3), 1, %s983_s25  }
  0x2b   : > { %188 = sbr.rel (%p185_p3) target bundleno = 820 (0x334), region = 32  ;;  %s726_s22 = sshll.u32 (!%p185_p3), %s190_s21, 6 }
  0x2c   : > { %s191_s23 = scalar_lea.sflag (!%p185_p3), [#allocation5], %s190_s21  ;;  %s1129_s24 = scalar_lea.vmem (!%p185_p3), [#allocation4], %s726_s22 }
  0x32   : > { %960 = dma.done.wait (%p1079_p7), %s191_s23, 1024  }
  0x33   : > { %962 = vsyncadd (%p1079_p7), %s191_s23, 4294966272  ;;  %p217_p9 = scmp.lt.s32.totalorder %s1062_s28, 1  ;;  %p727_p8 = scmp.ne.s32.totalorder %s1062_s28, 0 }
  0x35   : > { %s1137_s16 = scalar_select %p217_p9, %s1062_s28, 1 }
  0x36   : > { %224 = sbr.rel (%p727_p8) target bundleno = 76 (0x4c), region = 40 }
  0x37   : > { %s219_s19 = scalar_lea.vmem %s1242_s5, %s1137_s16 }
  0x3d   : > { %v257_v0 = vld [vmem:[%s1237_s0] sm:$0xff]  ;;  %v259_v1 = vld [vmem:[%s1237_s0 + $0x8] sm:$0xff] }
  0x3e   : > { %258 = vst [vmem:[#allocation7] sm:$0xff] %v257_v0  ;;  %260 = vst [vmem:[#allocation7 + $0x8] sm:$0xff] %v259_v1 }
  0x3f   : > { %268 = vsyncadd [#allocation10], 256 }
  0x40   : > { %963 = dma.done.wait [#allocation10], 256 }
  0x41   : > { %964 = vsyncadd [#allocation10], 4294967040 }
  0x42   : > { %v304_v2 = vld [vmem:[%s1238_s1] sm:$0xff] }
  0x43   : > { %305 = vst [vmem:[#allocation2] sm:$0xff] %v304_v2 }
  0x44   : > { %313 = vsyncadd [#allocation12], 128 }
  0x45   : > { %965 = dma.done.wait [#allocation12], 128 }
  0x46   : > { %966 = vsyncadd [#allocation12], 4294967168 }
  0x47   : > { %v335_v3 = vld [vmem:[%s1239_s2] sm:$0xf] }
  0x48   : > { %336 = vst [vmem:[#allocation3] sm:$0xf] %v335_v3 }
  0x49   : > { %361 = vsyncadd [#allocation14], 64 }
  0x4a   : > { %967 = dma.done.wait [#allocation14], 64 }
  0x4b   : > { %968 = vsyncadd [#allocation14], 4294967232 }
  0x4c PF: > { %v853_v4 = vld [vmem:[%s1129_s24] sm:$0xff]   ;;  %v996_v5 = vmov 0.0   ;;  %v854_v6 = vld [vmem:[%s1129_s24 + $0x8] sm:$0xff]   ;;  %vm997_vm0 = vmmov 0   ;;  %v855_v7 = vld [vmem:[%s1129_s24 + $0x10] sm:$0xff]   ;;  %vm484_vm1 = vcmask 130048  }
  0x4d   : > { %760 = vmatprep.subr.bf16.mxu0 %v996_v5  ;;  %780 = vmatprep.subr.bf16.mxu1 %v996_v5  ;;  %v856_v8 = vld [vmem:[%s1129_s24 + $0x18] sm:$0xff]   ;;  %v857_v9 = vld [vmem:[%s1129_s24 + $0x20] sm:$0xff]   ;;  %v858_v10 = vld [vmem:[%s1129_s24 + $0x28] sm:$0xff]   ;;  %v998_v26 = vmov 0   ;;  %vm533_vm2 = vcmask 1043456   ;;  %vm529_vm3 = vcmask 64512  }
  0x4e   : > { %761 = vmatpush3.bf16.msra.mxu0 %v853_v4  ;;  %776 = vmatprep.mubr.msk.bf16.mxu0 %vm997_vm0, %v996_v5  ;;  %v859_v11 = vld [vmem:[%s1129_s24 + $0x30] sm:$0xff]   ;;  %v860_v12 = vld [vmem:[%s1129_s24 + $0x38] sm:$0xff]   ;;  %v366_v13 = vld [vmem:[#allocation7] sm:$0xff]  ;;  %p739_p7 = scmp.ne.s32.totalorder %s1062_s28, 1 }
  0x4f   : > { %762 = vmatprep.subr.bf16.mxu0 %v996_v5  ;;  %782 = vmatprep.mubr.msk.bf16.mxu1 %vm997_vm0, %v996_v5  ;;  %v367_v14 = vld [vmem:[#allocation7 + $0x8] sm:$0xff]  ;;  %v728_v16 = vld [vmem:[%s219_s19] ss:$0 sm:$0xff]  ;;  %v369_v24 = vld [vmem:[#allocation3] sm:$0xf] }
  0x50   : > { %v387_v15 = vpack.c.bf16 %v367_v14, %v366_v13  ;;  %v578_v25 = vld [vmem:[%s1240_s3] sm:$0xff]  ;;  %852 = vset.pattern.permute.xlu0 %v998_v26  ;;  %v579_v27 = vld [vmem:[%s1240_s3 + $0x8] sm:$0xff] }
  0x51   : > { %582 = vperm.xlu0 %852, %v578_v25   ;;  %v368_v34 = vld [vmem:[#allocation2] sm:$0xff] }
  0x52   : > { %763 = vmatpush3.bf16.msra.mxu0 %v854_v6 }
  0x53   : > { %764 = vmatprep.subr.bf16.mxu0 %v996_v5 }
  0x55   : > { %587 = vperm.xlu0 %852, %v579_v27  }
  0x56   : > { %765 = vmatpush3.bf16.msra.mxu0 %v855_v7 }
  0x57   : > { %766 = vmatprep.subr.bf16.mxu0 %v996_v5 }
  0x5a   : > { %767 = vmatpush3.bf16.msra.mxu0 %v856_v8 }
  0x5b   : > { %768 = vmatprep.subr.bf16.mxu0 %v996_v5 }
  0x5e   : > { %769 = vmatpush3.bf16.msra.mxu0 %v857_v9 }
  0x5f   : > { %770 = vmatprep.subr.bf16.mxu0 %v996_v5 }
  0x62   : > { %771 = vmatpush3.bf16.msra.mxu0 %v858_v10 }
  0x63   : > { %772 = vmatprep.subr.bf16.mxu0 %v996_v5 }
  0x66   : > { %773 = vmatpush3.bf16.msra.mxu0 %v859_v11 }
  0x67   : > { %774 = vmatprep.subr.bf16.mxu0 %v996_v5 }
  0x6a   : > { %775 = vmatpush3.bf16.msra.mxu0 %v860_v12 }
  0x6d   : > { %777 = vmatmul.mubr.bf16.vlgmr.msra.gmra.mrb[0].mxu0 %v387_v15 }
  0xd0   : > { %v583_v35 = vpop.permute.xlu0 %582 }
  0xd4   : > { %v588_v39 = vpop.permute.xlu0 %587 }
 0x140   : > { %v476_v17 = vpop.f32.mrb[0].mxu0 }
 0x141   : > { %v778_v18 = vpop.f32.mrb[1].mxu0  ;;  %v477_v20 = vadd.f32 %v728_v16, %v476_v17 }
 0x142   : > { %v479_v19 = vpop.f32.mrb[2].mxu0 }
 0x143   : > { %v480_v21 = vadd.f32 %v728_v16, %v479_v19  ;;  %v779_v22 = vpop.f32.mrb[3].mxu0 }
 0x145   : > { %v483_v23 = vpack.c.bf16 %v480_v21, %v477_v20 }
 0x147   : > { %781 = vmatpush3.bf16.msra.mxu1 %v483_v23 }
 0x148   : > { %786 = vmatprep.subr.bf16.mxu1 %v996_v5 }
 0x14a   : > { %783 = vmatmul.mubr.msk.bf16.vlgmr.msra.gmra.mrb[0].mxu1 %vm484_vm1, %v369_v24 }
 0x14b   : > { %788 = vmatprep.mubr.msk.bf16.mxu1 %vm997_vm0, %v996_v5 }
 0x21d   : > { %v522_v28 = vpop.f32.mrb[0].mxu1 }
 0x21e   : > { %v528_v29 = vpack.c.bf16 %v522_v28, %v522_v28  ;;  %v784_v30 = vpop.f32.mrb[1].mxu1  ;;  %602 = vst [vmem:[#allocation8] sm:$0xff] (!%p739_p7), %v522_v28 }
 0x21f   : > { %v525_v31 = vpop.f32.mrb[2].mxu1 }
 0x220   : > { %v535_v32 = vsel %vm533_vm2, %v528_v29, 0  ;;  %v785_v33 = vpop.f32.mrb[3].mxu1 }
 0x221   : > { %787 = vmatpush3.bf16.msra.mxu1 %v535_v32 }
 0x224   : > { %789 = vmatmul.mubr.msk.bf16.vlgmr.msra.gmra.mrb[4].mxu1 %vm529_vm3, %v368_v34 }
 0x2f7   : > { %v571_v36 = vpop.f32.mrb[4].mxu1 }
 0x2f8   : > { %v590_v37 = vmul.f32 %v583_v35, %v571_v36  ;;  %v790_v38 = vpop.f32.mrb[5].mxu1 }
 0x2f9   : > { %v574_v40 = vpop.f32.mrb[6].mxu1 }
 0x2fa   : > { %v592_v41 = vadd.f32 %v590_v37, %v477_v20  ;;  %v591_v42 = vmul.f32 %v588_v39, %v574_v40  ;;  %v791_v43 = vpop.f32.mrb[7].mxu1  ;;  %601 = sbr.rel (%p739_p7) target bundleno = 769 (0x301), region = 145 }
 0x2fc   : > { %v594_v44 = vmax.f32 %v592_v41, 0.0  ;;  %v593_v45 = vadd.f32 %v591_v42, %v480_v21 }
 0x2fe   : > { %596 = vst [vmem:[#allocation7] sm:$0xff] %v594_v44  ;;  %v595_v46 = vmax.f32 %v593_v45, 0.0 }
 0x300   : > { %597 = vst [vmem:[#allocation7 + $0x8] sm:$0xff] %v595_v46 }
 0x301 PF: > { %p807_p4 = scmp.eq.s32.totalorder %s1062_s28, 1  ;;  %s999_s16 = smov [#allocation7]  }
 0x302   : > { %s609_s27 = sshll.u32 %s999_s16, 4  ;;  %s610_s27 = int_to_ptr.vmem [resolvable:$true] %s609_s27 }
 0x303   : > { %s891_s18 = scalar_lea.vmem %s610_s27, 256  ;;  %p898_p12 = scmp.lt.s32.totalorder %s610_s27, %s610_s27 }
 0x304   : > { %p892_p5 = scmp.ne.s32.totalorder %s610_s27, %s891_s18  ;;  %p899_p0 = scmp.lt.s32.totalorder %s891_s18, %s891_s18 }
 0x306   : > { %p893_p6 = pnand %p892_p5, %p807_p4  ;;  %p900_p1 = por %p899_p0, %p898_p12 }
 0x308   : > { %p894_p10 = pneg %p893_p6 }
 0x30a   : > { %p901_p2 = pnand %p900_p1, %p894_p10 }
 0x30c   : > { %904 = shalt.err (!%p901_p2)
}
 0x30d   : > { %s905_s30 = scalar_lea.hbm %s1243_s6, 256 }
 0x30e   : > { %p906_p11 = scmp.ne.s32.totalorder %s1243_s6, %s905_s30  ;;  %p911_p9 = scmp.lt.u32.totalorder %s905_s30, %s1243_s6 }
 0x310   : > { %p907_p13 = pnand %p906_p11, %p807_p4 }
 0x312   : > { %p908_p3 = pneg %p907_p13 }
 0x314   : > { %p913_p8 = pnand %p911_p9, %p908_p3 }
 0x316   : > { %916 = shalt.err (!%p913_p8)
}
 0x317   : > { %s1000_s13 = smov 128   ;;  %s1001_s14 = smov 8  }
 0x318   : > { %795 = dma.vmem_to_hbm [thread:$0]  (%p807_p4), %s610_s27, 256, %s1243_s6, [#allocation6], %s1000_s13, %s1000_s13, %s1001_s14  }
 0x319   : > { %s1002_s21 = smov [#allocation8]  }
 0x31a   : > { %s623_s22 = sshll.u32 %s1002_s21, 4  ;;  %s624_s22 = int_to_ptr.vmem [resolvable:$true] %s623_s22 }
 0x31b   : > { %s917_s23 = scalar_lea.vmem %s624_s22, 128  ;;  %p924_p10 = scmp.lt.s32.totalorder %s624_s22, %s624_s22 }
 0x31c   : > { %p918_p7 = scmp.ne.s32.totalorder %s624_s22, %s917_s23  ;;  %p925_p12 = scmp.lt.s32.totalorder %s917_s23, %s917_s23 }
 0x31e   : > { %p919_p5 = pnand %p918_p7, %p807_p4  ;;  %p926_p0 = por %p925_p12, %p924_p10 }
 0x320   : > { %p920_p6 = pneg %p919_p5 }
 0x322   : > { %p927_p1 = pnand %p926_p0, %p920_p6 }
 0x324   : > { %930 = shalt.err (!%p927_p1)
}
 0x325   : > { %s931_s18 = scalar_lea.hbm %s1244_s7, 128 }
 0x326   : > { %p932_p2 = scmp.ne.s32.totalorder %s1244_s7, %s931_s18  ;;  %p937_p3 = scmp.lt.u32.totalorder %s931_s18, %s1244_s7 }
 0x328   : > { %p933_p11 = pnand %p932_p2, %p807_p4 }
 0x32a   : > { %p934_p13 = pneg %p933_p11 }
 0x32c   : > { %p939_p9 = pnand %p937_p3, %p934_p13 }
 0x32e   : > { %942 = shalt.err (!%p939_p9)
}
 0x32f   : > { %797 = dma.vmem_to_hbm [thread:$0]  (%p807_p4), %s624_s22, 128, %s1244_s7, [#allocation9]  }
 0x330   : > { %970 = dma.done.wait (%p807_p4), [#allocation6], 256  }
 0x331   : > { %972 = vsyncadd (%p807_p4), [#allocation6], 4294967040 }
 0x332   : > { %974 = dma.done.wait (%p807_p4), [#allocation9], 128  }
 0x333   : > { %976 = vsyncadd (%p807_p4), [#allocation9], 4294967168 }
 0x334 PF: > { %p20_p8 = scmp.ge.s32.totalorder %s1065_s29, 4   ;;  %s1248_s24 = smov %s983_s25 }
 0x335   : > { %s1249_s25 = smov %s987_s26  ;;  %s1250_s26 = smov %s1075_s9 }
 0x336   : > { %s1251_s27 = smov %s1065_s29  ;;  %22 = sbr.rel (!%p20_p8) target bundleno = 5 (0x5), region = 215 }
 0x33d   :  { %640 = vsyncpa [#allocation5], 1 }
 0x33e   :  { %642 = vsyncpa [#allocation5 + $0x1], 1 }
 0x33f   :  { %643 = vsyncpa [#allocation6], 1 }
 0x340   :  { %645 = vsyncpa [#allocation6 + $0x1], 1 }
 0x341   :  { %646 = vsyncpa [#allocation9], 1 }

</bundles_post_ra>
